<compile_context>
chip_gen: v7x
topology: tpu7x:2x2x1
jax: 0.10.0
libtpu: 0.0.40
codegen_flags: <defaults>
</compile_context>

<pallas_src>
import numpy as np
import jax
import jax.numpy as jnp
from jax.experimental import pallas as pl
from jax.experimental.pallas import tpu as pltpu


def _round_up(x, m):
    return ((x + m - 1) // m) * m


# ----------------------------------------------------------------------------
# Parameter construction (deterministic, mimics PyTorch Linear init ranges)
# ----------------------------------------------------------------------------
def _linear_params(key, in_dim, out_dim):
    kw, kb = jax.random.split(key)
    bound = 1.0 / np.sqrt(in_dim)
    w = jax.random.uniform(kw, (in_dim, out_dim), jnp.float32, -bound, bound)
    b = jax.random.uniform(kb, (1, out_dim), jnp.float32, -bound, bound)
    return w, b


def _key_stream(key):
    i = 0
    while True:
        yield jax.random.fold_in(key, i)
        i += 1


def _build_mlp(ks, input_dim, hidden_dim, output_dim, num_layers):
    """MLP(input_dim, hidden_dim, output_dim, num_layers):
       num_layers x (Linear + ReLU) then a final Linear (no ReLU)."""
    layers = []
    d = input_dim
    for _ in range(num_layers):
        w, b = _linear_params(next(ks), d, hidden_dim)
        layers.append((w, b, True))     # ReLU
        d = hidden_dim
    w, b = _linear_params(next(ks), hidden_dim, output_dim)
    layers.append((w, b, False))        # no ReLU
    return layers


def _build_shared_mlp(ks, input_dim, hidden_dim, output_dim):
    """SharedMLP: Linear -> ReLU -> Linear."""
    w1, b1 = _linear_params(next(ks), input_dim, hidden_dim)
    w2, b2 = _linear_params(next(ks), hidden_dim, output_dim)
    return [(w1, b1, True), (w2, b2, False)]


def build_clip_params(key, embed_dim, mlp_hidden_dim, mlp_layers,
                      csi_dim=900, mmwave_dim=1024):
    ks = _key_stream(key)
    params = {}
    params["mlp_csi"] = _build_mlp(ks, csi_dim, mlp_hidden_dim, embed_dim, mlp_layers)
    params["mlp_mmwave"] = _build_mlp(ks, mmwave_dim, mlp_hidden_dim, embed_dim, mlp_layers)
    params["shared_mlp"] = _build_shared_mlp(ks, embed_dim, mlp_hidden_dim, embed_dim)
    wc, bc = _linear_params(next(ks), embed_dim, embed_dim)
    params["csi_projection"] = (wc, bc, False)
    wm, bm = _linear_params(next(ks), embed_dim, embed_dim)
    params["mmwave_projection"] = (wm, bm, False)
    params["logit_scale"] = jnp.asarray(np.log(1.0 / 0.07), jnp.float32)
    return params


# ----------------------------------------------------------------------------
# One-time packing of parameters into kernel-friendly layouts.
#   W0: (2, K, DP)      bf16   big first-layer weights (csi padded 900->1024)
#   B0: (2, 1, DP)      f32    first-layer biases
#   WS: (2, L, DP, DP)  bf16   all remaining (small) weights, zero-padded
#   BS: (2, L, 1, DP)   f32    all remaining biases, zero-padded
# K and DP are padded to multiples of 128 (lane-dense tiles, full MXU N-width).
# Zero padding is exact: padded activation columns stay 0 through Linear+ReLU.
# ----------------------------------------------------------------------------
def pack_clip_params(params, step=1):
    shared = list(params["shared_mlp"])
    csi_layers = list(params["mlp_csi"]) + shared
    mm_layers = list(params["mlp_mmwave"]) + shared
    if step == 1 or step == 2:
        csi_layers = csi_layers + [params["csi_projection"]]
        mm_layers = mm_layers + [params["mmwave_projection"]]

    csi_dim = csi_layers[0][0].shape[0]
    mm_dim = mm_layers[0][0].shape[0]
    K = _round_up(max(csi_dim, mm_dim), 128)          # shared, lane-aligned input dim

    small_csi = csi_layers[1:]
    small_mm = mm_layers[1:]
    assert len(small_csi) == len(small_mm) and len(small_csi) >= 1

    dims = []
    for (w, _, _) in small_csi:
        dims.extend([w.shape[0], w.shape[1]])
    dims.append(csi_layers[0][0].shape[1])
    DP = _round_up(max(dims), 128)                    # lane-dense hidden/embed dim
    E = csi_layers[-1][0].shape[1]                    # true output dim

    def pad_w(w, rows, cols):
        return jnp.zeros((rows, cols), jnp.float32).at[:w.shape[0], :w.shape[1]].set(w)

    def pad_b(b, cols):
        return jnp.zeros((1, cols), jnp.float32).at[:, :b.shape[1]].set(b)

    w0c = pad_w(csi_layers[0][0], K, DP)
    w0m = pad_w(mm_layers[0][0], K, DP)
    b0c = pad_b(csi_layers[0][1], DP)
    b0m = pad_b(mm_layers[0][1], DP)
    W0 = jnp.stack([w0c, w0m]).astype(jnp.bfloat16)   # (2, K, DP)
    B0 = jnp.stack([b0c, b0m])                        # (2, 1, DP) f32

    def stack_small(layers):
        ws = [pad_w(w, DP, DP) for (w, _, _) in layers]
        bs = [pad_b(b, DP) for (_, b, _) in layers]
        return jnp.stack(ws), jnp.stack(bs)

    wsc, bsc = stack_small(small_csi)
    wsm, bsm = stack_small(small_mm)
    WS = jnp.stack([wsc, wsm]).astype(jnp.bfloat16)   # (2, L, DP, DP)
    BS = jnp.stack([bsc, bsm])                        # (2, L, 1, DP) f32

    relu_first = bool(csi_layers[0][2])
    relu_small = tuple(bool(r) for (_, _, r) in small_csi)
    assert relu_first == bool(mm_layers[0][2])
    assert relu_small == tuple(bool(r) for (_, _, r) in small_mm)

    return {
        "W0": W0, "B0": B0, "WS": WS, "BS": BS,
        "relu_first": relu_first, "relu_small": relu_small,
        "K": K, "DP": DP, "E": E,
        "csi_dim": csi_dim, "mm_dim": mm_dim,
        "logit_scale": params["logit_scale"],
    }


# ----------------------------------------------------------------------------
# Fused Pallas kernel: one grid step == one modality's entire Linear(+ReLU) chain
# on one batch tile (weights stay resident across batch tiles of that modality).
# ----------------------------------------------------------------------------
def _make_fused_kernel(n_small, relu_first, relu_small):
    relu_small = tuple(relu_small)

    def kernel(x_ref, w0_ref, b0_ref, ws_ref, bs_ref, out_ref):
        # x_ref:  (BM, K)      bf16
        # w0_ref: (K, DP)      bf16     b0_ref: (1, DP)    f32
        # ws_ref: (L, DP, DP)  bf16     bs_ref: (L, 1, DP) f32
        # out_ref:(BM, DP)     bf16
        h = jnp.dot(x_ref[...], w0_ref[...],
                    preferred_element_type=jnp.float32) + b0_ref[...]
        if relu_first:
            h = jnp.maximum(h, 0.0)
        for i in range(n_small):                       # static unroll (L is small)
            h = jnp.dot(h.astype(jnp.bfloat16), ws_ref[i],
                        preferred_element_type=jnp.float32) + bs_ref[i]
            if relu_small[i]:
                h = jnp.maximum(h, 0.0)
        out_ref[...] = h.astype(out_ref.dtype)

    return kernel


def _pad_and_stack_inputs(csi, mmwave, Bp, K):
    """Pad/cast directly in bf16 (no f32 intermediate) and stack: (2, Bp, K)."""
    def pad_x(x):
        x = x.astype(jnp.bfloat16)
        return jnp.pad(x, ((0, Bp - x.shape[0]), (0, K - x.shape[1])))
    return jnp.stack([pad_x(csi), pad_x(mmwave)])


# ----------------------------------------------------------------------------
# CLIP.forward equivalent
# ----------------------------------------------------------------------------
def clip_forward(packed, csi, mmwave, *, batch_tile=256, out_dtype=jnp.bfloat16):
    # batch_tile=256 fills the v6e/v7x MXU M dimension; use 128 on v5e.
    K, DP, E = packed["K"], packed["DP"], packed["E"]
    B = csi.shape[0]
    n_small = packed["WS"].shape[1]

    # Batch padding / tiling: multiple of 16 (bf16 sublane packing) for small
    # batches; BM-row tiles with weights resident for production batches.
    Bp16 = _round_up(max(B, 1), 16)
    if Bp16 <= batch_tile:
        BM = Bp16
        Bp = Bp16
    else:
        BM = batch_tile
        Bp = _round_up(B, BM)
    nb = Bp // BM

    x_st = _pad_and_stack_inputs(csi, mmwave, Bp, K)        # (2, Bp, K) bf16
    kernel = _make_fused_kernel(n_small, packed["relu_first"], packed["relu_small"])

    # Double-buffered VMEM footprint of all blocks + headroom for the f32 h tile.
    out_itemsize = np.dtype(out_dtype).itemsize
    blk_bytes = 2 * (BM * K * 2 + K * DP * 2 + DP * 4
                     + n_small * DP * DP * 2 + n_small * DP * 4
                     + BM * DP * out_itemsize)
    vmem_limit = int(min(max(blk_bytes + 2 * BM * DP * 4, 32 * 2**20), 100 * 2**20))

    out = pl.pallas_call(
        kernel,
        grid=(2, nb),                                       # (modality, batch tile)
        in_specs=[
            pl.BlockSpec((None, BM, K), lambda m, b: (m, b, 0)),
            pl.BlockSpec((None, K, DP), lambda m, b: (m, 0, 0)),        # resident over b
            pl.BlockSpec((None, 1, DP), lambda m, b: (m, 0, 0)),        # resident over b
            pl.BlockSpec((None, n_small, DP, DP), lambda m, b: (m, 0, 0, 0)),
            pl.BlockSpec((None, n_small, 1, DP), lambda m, b: (m, 0, 0, 0)),
        ],
        out_specs=pl.BlockSpec((None, BM, DP), lambda m, b: (m, b, 0)),
        out_shape=jax.ShapeDtypeStruct((2, Bp, DP), out_dtype),
        compiler_params=pltpu.CompilerParams(
            dimension_semantics=("parallel", "parallel"),
            vmem_limit_bytes=vmem_limit),
    )(x_st, packed["W0"], packed["B0"], packed["WS"], packed["BS"])

    # Slice off batch/feature padding; cast the small result back to f32.
    csi_embed = jnp.squeeze(out[0, :B, :E].astype(jnp.float32))
    mmwave_embed = jnp.squeeze(out[1, :B, :E].astype(jnp.float32))
    return {
        "csi_embed": csi_embed,
        "mmwave_embed": mmwave_embed,
        "logit_scale": jnp.exp(packed["logit_scale"]),
    }


# ----------------------------------------------------------------------------
# References for verification
# ----------------------------------------------------------------------------
def _ref_forward_packed(packed, csi, mmwave, out_dtype=jnp.bfloat16):
    """Pure-JAX mirror of the exact kernel math (bf16 operands, f32 accumulate,
    bf16 output)."""
    K, DP, E = packed["K"], packed["DP"], packed["E"]
    B = csi.shape[0]
    Bp = _round_up(max(B, 1), 16)
    x_st = _pad_and_stack_inputs(csi, mmwave, Bp, K)

    outs = []
    for m in range(2):
        h = jnp.dot(x_st[m], packed["W0"][m],
                    preferred_element_type=jnp.float32) + packed["B0"][m]
        if packed["relu_first"]:
            h = jnp.maximum(h, 0.0)
        for i, relu in enumerate(packed["relu_small"]):
            h = jnp.dot(h.astype(jnp.bfloat16), packed["WS"][m, i],
                        preferred_element_type=jnp.float32) + packed["BS"][m, i]
            if relu:
                h = jnp.maximum(h, 0.0)
        outs.append(h.astype(out_dtype))
    out = jnp.stack(outs)
    return {
        "csi_embed": jnp.squeeze(out[0, :B, :E].astype(jnp.float32)),
        "mmwave_embed": jnp.squeeze(out[1, :B, :E].astype(jnp.float32)),
    }


def _ref_chain_f32(x, layers):
    h = x
    for (w, b, relu) in layers:
        h = h @ w + b
        if relu:
            h = jnp.maximum(h, 0.0)
    return h


if __name__ == "__main__":
    # Small config consistent with the module's forward:
    #   csi features = 900 (mlp_csi input), mmwave features = 1024 (mlp_mmwave input)
    B = 4
    embed_dim = 32
    mlp_hidden_dim = 32
    mlp_layers = 2
    step = 1
    CSI_DIM = 900
    MMWAVE_DIM = 1024

    root = jax.random.PRNGKey(0)
    k_params, k_csi, k_mm = jax.random.split(root, 3)

    raw = build_clip_params(k_params, embed_dim, mlp_hidden_dim, mlp_layers,
                            csi_dim=CSI_DIM, mmwave_dim=MMWAVE_DIM)
    packed = pack_clip_params(raw, step=step)

    csi = jax.random.normal(k_csi, (B, CSI_DIM), jnp.float32)
    mmwave = jax.random.normal(k_mm, (B, MMWAVE_DIM), jnp.float32)

    out = clip_forward(packed, csi, mmwave)
    out = jax.block_until_ready(out)

    # 1) Tight check: kernel vs. pure-JAX mirror of the same bf16/f32 math.
    #    (tolerance covers MXU vs XLA accumulation-order differences + final bf16 cast)
    ref = _ref_forward_packed(packed, csi, mmwave)
    np.testing.assert_allclose(np.asarray(out["csi_embed"]),
                               np.asarray(ref["csi_embed"]), rtol=1e-2, atol=1e-2)
    np.testing.assert_allclose(np.asarray(out["mmwave_embed"]),
                               np.asarray(ref["mmwave_embed"]), rtol=1e-2, atol=1e-2)

    # 2) Loose check: kernel (bf16 weights/operands/output) vs. original f32 semantics.
    csi_layers = list(raw["mlp_csi"]) + list(raw["shared_mlp"]) + [raw["csi_projection"]]
    mm_layers = list(raw["mlp_mmwave"]) + list(raw["shared_mlp"]) + [raw["mmwave_projection"]]
    ref_csi_f32 = jnp.squeeze(_ref_chain_f32(csi, csi_layers))
    ref_mm_f32 = jnp.squeeze(_ref_chain_f32(mmwave, mm_layers))
    np.testing.assert_allclose(np.asarray(out["csi_embed"]), np.asarray(ref_csi_f32),
                               rtol=1e-1, atol=1e-1)
    np.testing.assert_allclose(np.asarray(out["mmwave_embed"]), np.asarray(ref_mm_f32),
                               rtol=1e-1, atol=1e-1)
    np.testing.assert_allclose(np.asarray(out["logit_scale"]),
                               np.exp(np.log(1.0 / 0.07)), rtol=1e-5)

    print("KERNEL_OK")
</pallas_src>

<mosaic_0001>
module attributes {stable_mosaic.version = 11 : i64} {
  func.func @kernel(%arg0: i32, %arg1: i32, %arg2: memref<1x16x1024xbf16, #tpu.memory_space<vmem>>, %arg3: memref<1x1024x128xbf16, #tpu.memory_space<vmem>>, %arg4: memref<1x1x128xf32, #tpu.memory_space<vmem>>, %arg5: memref<1x5x128x128xbf16, #tpu.memory_space<vmem>>, %arg6: memref<1x5x1x128xf32, #tpu.memory_space<vmem>>, %arg7: memref<1x16x128xbf16, #tpu.memory_space<vmem>>) attributes {dimension_semantics = [#tpu.dimension_semantics<parallel>, #tpu.dimension_semantics<parallel>], iteration_bounds = array<i64: 2, 1>, scalar_prefetch = 0 : i64, scratch_operands = 0 : i64, tpu.core_type = #tpu.core_type<tc>, window_params = [{transform_indices = @transform_0, window_bounds = array<i64: 1, 16, 1024>}, {transform_indices = @transform_1, window_bounds = array<i64: 1, 1024, 128>}, {transform_indices = @transform_2, window_bounds = array<i64: 1, 1, 128>}, {transform_indices = @transform_3, window_bounds = array<i64: 1, 5, 128, 128>}, {transform_indices = @transform_4, window_bounds = array<i64: 1, 5, 1, 128>}, {transform_indices = @transform_5, window_bounds = array<i64: 1, 16, 128>}]} {
    %c0 = arith.constant 0 : index
    %c0_0 = arith.constant 0 : index
    %c0_1 = arith.constant 0 : index
    %0 = vector.load %arg2[%c0, %c0_0, %c0_1] : memref<1x16x1024xbf16, #tpu.memory_space<vmem>>, vector<1x16x1024xbf16>
    %1 = vector.shape_cast %0 : vector<1x16x1024xbf16> to vector<16x1024xbf16>
    %c0_2 = arith.constant 0 : index
    %c0_3 = arith.constant 0 : index
    %c0_4 = arith.constant 0 : index
    %2 = vector.load %arg3[%c0_2, %c0_3, %c0_4] : memref<1x1024x128xbf16, #tpu.memory_space<vmem>>, vector<1x1024x128xbf16>
    %3 = vector.shape_cast %2 : vector<1x1024x128xbf16> to vector<1024x128xbf16>
    %cst = arith.constant dense<0.000000e+00> : vector<16x128xf32>
    %4 = tpu.matmul %1, %3, %cst {dimension_numbers = #tpu.dot_dimension_numbers<[1], [0], [0], [1], [0, 0, 1, 1], [], []>} : vector<16x1024xbf16>, vector<1024x128xbf16>, vector<16x128xf32> -> vector<16x128xf32>
    %c0_5 = arith.constant 0 : index
    %c0_6 = arith.constant 0 : index
    %c0_7 = arith.constant 0 : index
    %5 = vector.load %arg4[%c0_5, %c0_6, %c0_7] : memref<1x1x128xf32, #tpu.memory_space<vmem>>, vector<1x1x128xf32>
    %6 = vector.shape_cast %5 : vector<1x1x128xf32> to vector<1x128xf32>
    %7 = vector.broadcast %6 : vector<1x128xf32> to vector<16x128xf32>
    %8 = arith.addf %4, %7 : vector<16x128xf32>
    %cst_8 = arith.constant 0.000000e+00 : f32
    %9 = vector.broadcast %cst_8 : f32 to vector<16x128xf32>
    %10 = arith.maximumf %8, %9 : vector<16x128xf32>
    %11 = arith.truncf %10 : vector<16x128xf32> to vector<16x128xbf16>
    %c0_9 = arith.constant 0 : index
    %c0_10 = arith.constant 0 : index
    %c0_11 = arith.constant 0 : index
    %c0_12 = arith.constant 0 : index
    %12 = vector.load %arg5[%c0_9, %c0_10, %c0_11, %c0_12] : memref<1x5x128x128xbf16, #tpu.memory_space<vmem>>, vector<1x1x128x128xbf16>
    %13 = vector.shape_cast %12 : vector<1x1x128x128xbf16> to vector<128x128xbf16>
    %cst_13 = arith.constant dense<0.000000e+00> : vector<16x128xf32>
    %14 = tpu.matmul %11, %13, %cst_13 {dimension_numbers = #tpu.dot_dimension_numbers<[1], [0], [0], [1], [0, 0, 1, 1], [], []>} : vector<16x128xbf16>, vector<128x128xbf16>, vector<16x128xf32> -> vector<16x128xf32>
    %c0_14 = arith.constant 0 : index
    %c0_15 = arith.constant 0 : index
    %c0_16 = arith.constant 0 : index
    %c0_17 = arith.constant 0 : index
    %15 = vector.load %arg6[%c0_14, %c0_15, %c0_16, %c0_17] : memref<1x5x1x128xf32, #tpu.memory_space<vmem>>, vector<1x1x1x128xf32>
    %16 = vector.shape_cast %15 : vector<1x1x1x128xf32> to vector<1x128xf32>
    %17 = vector.broadcast %16 : vector<1x128xf32> to vector<16x128xf32>
    %18 = arith.addf %14, %17 : vector<16x128xf32>
    %cst_18 = arith.constant 0.000000e+00 : f32
    %19 = vector.broadcast %cst_18 : f32 to vector<16x128xf32>
    %20 = arith.maximumf %18, %19 : vector<16x128xf32>
    %21 = arith.truncf %20 : vector<16x128xf32> to vector<16x128xbf16>
    %c0_19 = arith.constant 0 : index
    %c1 = arith.constant 1 : index
    %c0_20 = arith.constant 0 : index
    %c0_21 = arith.constant 0 : index
    %22 = vector.load %arg5[%c0_19, %c1, %c0_20, %c0_21] : memref<1x5x128x128xbf16, #tpu.memory_space<vmem>>, vector<1x1x128x128xbf16>
    %23 = vector.shape_cast %22 : vector<1x1x128x128xbf16> to vector<128x128xbf16>
    %cst_22 = arith.constant dense<0.000000e+00> : vector<16x128xf32>
    %24 = tpu.matmul %21, %23, %cst_22 {dimension_numbers = #tpu.dot_dimension_numbers<[1], [0], [0], [1], [0, 0, 1, 1], [], []>} : vector<16x128xbf16>, vector<128x128xbf16>, vector<16x128xf32> -> vector<16x128xf32>
    %c0_23 = arith.constant 0 : index
    %c1_24 = arith.constant 1 : index
    %c0_25 = arith.constant 0 : index
    %c0_26 = arith.constant 0 : index
    %25 = vector.load %arg6[%c0_23, %c1_24, %c0_25, %c0_26] : memref<1x5x1x128xf32, #tpu.memory_space<vmem>>, vector<1x1x1x128xf32>
    %26 = vector.shape_cast %25 : vector<1x1x1x128xf32> to vector<1x128xf32>
    %27 = vector.broadcast %26 : vector<1x128xf32> to vector<16x128xf32>
    %28 = arith.addf %24, %27 : vector<16x128xf32>
    %29 = arith.truncf %28 : vector<16x128xf32> to vector<16x128xbf16>
    %c0_27 = arith.constant 0 : index
    %c2 = arith.constant 2 : index
    %c0_28 = arith.constant 0 : index
    %c0_29 = arith.constant 0 : index
    %30 = vector.load %arg5[%c0_27, %c2, %c0_28, %c0_29] : memref<1x5x128x128xbf16, #tpu.memory_space<vmem>>, vector<1x1x128x128xbf16>
    %31 = vector.shape_cast %30 : vector<1x1x128x128xbf16> to vector<128x128xbf16>
    %cst_30 = arith.constant dense<0.000000e+00> : vector<16x128xf32>
    %32 = tpu.matmul %29, %31, %cst_30 {dimension_numbers = #tpu.dot_dimension_numbers<[1], [0], [0], [1], [0, 0, 1, 1], [], []>} : vector<16x128xbf16>, vector<128x128xbf16>, vector<16x128xf32> -> vector<16x128xf32>
    %c0_31 = arith.constant 0 : index
    %c2_32 = arith.constant 2 : index
    %c0_33 = arith.constant 0 : index
    %c0_34 = arith.constant 0 : index
    %33 = vector.load %arg6[%c0_31, %c2_32, %c0_33, %c0_34] : memref<1x5x1x128xf32, #tpu.memory_space<vmem>>, vector<1x1x1x128xf32>
    %34 = vector.shape_cast %33 : vector<1x1x1x128xf32> to vector<1x128xf32>
    %35 = vector.broadcast %34 : vector<1x128xf32> to vector<16x128xf32>
    %36 = arith.addf %32, %35 : vector<16x128xf32>
    %cst_35 = arith.constant 0.000000e+00 : f32
    %37 = vector.broadcast %cst_35 : f32 to vector<16x128xf32>
    %38 = arith.maximumf %36, %37 : vector<16x128xf32>
    %39 = arith.truncf %38 : vector<16x128xf32> to vector<16x128xbf16>
    %c0_36 = arith.constant 0 : index
    %c3 = arith.constant 3 : index
    %c0_37 = arith.constant 0 : index
    %c0_38 = arith.constant 0 : index
    %40 = vector.load %arg5[%c0_36, %c3, %c0_37, %c0_38] : memref<1x5x128x128xbf16, #tpu.memory_space<vmem>>, vector<1x1x128x128xbf16>
    %41 = vector.shape_cast %40 : vector<1x1x128x128xbf16> to vector<128x128xbf16>
    %cst_39 = arith.constant dense<0.000000e+00> : vector<16x128xf32>
    %42 = tpu.matmul %39, %41, %cst_39 {dimension_numbers = #tpu.dot_dimension_numbers<[1], [0], [0], [1], [0, 0, 1, 1], [], []>} : vector<16x128xbf16>, vector<128x128xbf16>, vector<16x128xf32> -> vector<16x128xf32>
    %c0_40 = arith.constant 0 : index
    %c3_41 = arith.constant 3 : index
    %c0_42 = arith.constant 0 : index
    %c0_43 = arith.constant 0 : index
    %43 = vector.load %arg6[%c0_40, %c3_41, %c0_42, %c0_43] : memref<1x5x1x128xf32, #tpu.memory_space<vmem>>, vector<1x1x1x128xf32>
    %44 = vector.shape_cast %43 : vector<1x1x1x128xf32> to vector<1x128xf32>
    %45 = vector.broadcast %44 : vector<1x128xf32> to vector<16x128xf32>
    %46 = arith.addf %42, %45 : vector<16x128xf32>
    %47 = arith.truncf %46 : vector<16x128xf32> to vector<16x128xbf16>
    %c0_44 = arith.constant 0 : index
    %c4 = arith.constant 4 : index
    %c0_45 = arith.constant 0 : index
    %c0_46 = arith.constant 0 : index
    %48 = vector.load %arg5[%c0_44, %c4, %c0_45, %c0_46] : memref<1x5x128x128xbf16, #tpu.memory_space<vmem>>, vector<1x1x128x128xbf16>
    %49 = vector.shape_cast %48 : vector<1x1x128x128xbf16> to vector<128x128xbf16>
    %cst_47 = arith.constant dense<0.000000e+00> : vector<16x128xf32>
    %50 = tpu.matmul %47, %49, %cst_47 {dimension_numbers = #tpu.dot_dimension_numbers<[1], [0], [0], [1], [0, 0, 1, 1], [], []>} : vector<16x128xbf16>, vector<128x128xbf16>, vector<16x128xf32> -> vector<16x128xf32>
    %c0_48 = arith.constant 0 : index
    %c4_49 = arith.constant 4 : index
    %c0_50 = arith.constant 0 : index
    %c0_51 = arith.constant 0 : index
    %51 = vector.load %arg6[%c0_48, %c4_49, %c0_50, %c0_51] : memref<1x5x1x128xf32, #tpu.memory_space<vmem>>, vector<1x1x1x128xf32>
    %52 = vector.shape_cast %51 : vector<1x1x1x128xf32> to vector<1x128xf32>
    %53 = vector.broadcast %52 : vector<1x128xf32> to vector<16x128xf32>
    %54 = arith.addf %50, %53 : vector<16x128xf32>
    %55 = arith.truncf %54 : vector<16x128xf32> to vector<16x128xbf16>
    %c0_52 = arith.constant 0 : index
    %c0_53 = arith.constant 0 : index
    %c0_54 = arith.constant 0 : index
    %56 = vector.load %arg7[%c0_52, %c0_53, %c0_54] : memref<1x16x128xbf16, #tpu.memory_space<vmem>>, vector<1x16x128xbf16>
    %57 = vector.shape_cast %56 : vector<1x16x128xbf16> to vector<16x128xbf16>
    %58 = vector.shape_cast %55 : vector<16x128xbf16> to vector<1x16x128xbf16>
    tpu.vector_store %arg7[%c0_52, %c0_53, %c0_54], %58 {strides = array<i32>} : memref<1x16x128xbf16, #tpu.memory_space<vmem>>, vector<1x16x128xbf16>,
    return
  }
  func.func @transform_0(%arg0: i32, %arg1: i32) -> (i32, i32, i32) {
    %c0_i32 = arith.constant 0 : i32
    %c0_i32_0 = arith.constant 0 : i32
    return %arg0, %arg1, %c0_i32 : i32, i32, i32
  }
  func.func @transform_1(%arg0: i32, %arg1: i32) -> (i32, i32, i32) {
    %c0_i32 = arith.constant 0 : i32
    %c0_i32_0 = arith.constant 0 : i32
    %c0_i32_1 = arith.constant 0 : i32
    return %arg0, %c0_i32, %c0_i32_0 : i32, i32, i32
  }
  func.func @transform_2(%arg0: i32, %arg1: i32) -> (i32, i32, i32) {
    %c0_i32 = arith.constant 0 : i32
    %c0_i32_0 = arith.constant 0 : i32
    %c0_i32_1 = arith.constant 0 : i32
    return %arg0, %c0_i32, %c0_i32_0 : i32, i32, i32
  }
  func.func @transform_3(%arg0: i32, %arg1: i32) -> (i32, i32, i32, i32) {
    %c0_i32 = arith.constant 0 : i32
    %c0_i32_0 = arith.constant 0 : i32
    %c0_i32_1 = arith.constant 0 : i32
    %c0_i32_2 = arith.constant 0 : i32
    return %arg0, %c0_i32, %c0_i32_0, %c0_i32_1 : i32, i32, i32, i32
  }
  func.func @transform_4(%arg0: i32, %arg1: i32) -> (i32, i32, i32, i32) {
    %c0_i32 = arith.constant 0 : i32
    %c0_i32_0 = arith.constant 0 : i32
    %c0_i32_1 = arith.constant 0 : i32
    %c0_i32_2 = arith.constant 0 : i32
    return %arg0, %c0_i32, %c0_i32_0, %c0_i32_1 : i32, i32, i32, i32
  }
  func.func @transform_5(%arg0: i32, %arg1: i32) -> (i32, i32, i32) {
    %c0_i32 = arith.constant 0 : i32
    %c0_i32_0 = arith.constant 0 : i32
    return %arg0, %arg1, %c0_i32 : i32, i32, i32
  }
}

</mosaic_0001>

<bundles_post_ra>
// kernel: tpu_custom_call.1
= control target key start
LH: loop header
LB: loop body
LE: loop exit
PB: predicated region body
PF: predicated region fallthrough
CT: control target
= control target key end

     0   :  { %s3173_s0 = inlined_call_operand.hbm [shape: bf16[2,16,1024], index: 0, kind: input, shape index: {}]   ;;  %s3174_s1 = inlined_call_operand.hbm [shape: bf16[2,1024,128], index: 1, kind: input, shape index: {}]   ;;  %s3175_s2 = inlined_call_operand.vmem [shape: f32[2,1,128], index: 2, kind: input, shape index: {}]   ;;  %s3176_s3 = inlined_call_operand.hbm [shape: bf16[2,5,128,128], index: 3, kind: input, shape index: {}]   ;;  %s3177_s4 = inlined_call_operand.vmem [shape: f32[2,5,1,128], index: 4, kind: input, shape index: {}]   ;;  %s3178_s5 = inlined_call_operand.hbm [shape: bf16[2,16,128], index: 5, kind: output, shape index: {}]  }
   0x1   :  { %3185 = sst [smem:[#allocation15_spill]] %s3173_s0 }
   0x2   :  { %3186 = sst [smem:[#allocation16_spill]] %s3174_s1 }
   0x3   :  { %10 = vsyncpa [#allocation3], 0 }
   0x4   :  { %12 = vsyncpa [#allocation3 + $0x1], 0 }
   0x5   :  { %13 = vsyncpa [#allocation6], 0 }
   0x6   :  { %15 = vsyncpa [#allocation6 + $0x1], 0 }
   0x7   :  { %16 = vsyncpa [#allocation4], 0 }
   0x8   :  { %18 = vsyncpa [#allocation4 + $0x1], 0  ;;  %s2719_s18 = smov 0   ;;  %s2721_s19 = smov 0  }
   0x9   :  { %s2723_s20 = smov 0   ;;  %s2725_s21 = smov 0  }
   0xa   :  { %s2727_s22 = smov 0   ;;  %s2729_s23 = smov 0  }
   0xb LB: > { %3187 = sst [smem:[#allocation12_spill]] %s2663_s20  ;;  %s2750_s24 = sadd.s32 4294967295, %s2675_s23   ;;  %s2675_s23 = sphi %s2729_s23, %s24_s23   ;;  %s2671_s22 = sphi %s2727_s22, %s3212_s22   ;;  %s2667_s21 = sphi %s2725_s21, %s3211_s21   ;;  %s2663_s20 = sphi %s2723_s20, %s3207_s20   ;;  %s2659_s19 = sphi %s2721_s19, %s3210_s19   ;;  %s2655_s18 = sphi %s2719_s18, %s3209_s18  }
   0xc   : > { %s1861_s25 = sadd.s32 4294967294, %s2675_s23   ;;  %s36_s26 = sadd.s32 1, %s2671_s22 }
   0xd   : > { %s45_s27 = sadd.s32 1, %s2663_s20  ;;  %p38_p0 = scmp.ge.s32.totalorder %s36_s26, 2 }
   0xe   : > { %p52_p1 = scmp.ne.s32.totalorder %s2663_s20, %s2659_s19  ;;  %p53_p2 = scmp.eq.s32.totalorder %s2675_s23, 0 }
   0xf   : > { %p58_p3 = scmp.ne.s32.totalorder %s2659_s19, %s2655_s18  ;;  %s3214_s26 = smov (%p38_p0, %s36_s26), 0 }
  0x10   : > { %3188 = sst [smem:[#allocation13_spill]] %s3214_s26  ;;  %p2762_p4 = por %p53_p2, %p52_p1 }
  0x11   : > { %p59_p5 = scmp.eq.s32.totalorder %s2750_s24, 0  ;;  %s40_s29 = ssub.s32 %s2671_s22, %s3214_s26 }
  0x12   : > { %p188_p6 = scmp.eq.s32.totalorder %s2750_s24, 1  ;;  %p43_p7 = scmp.eq.s32.totalorder %s40_s29, 0 }
  0x13   : > { %p2770_p8 = por %p59_p5, %p58_p3  ;;  %p194_p10 = scmp.eq.s32.totalorder %s1861_s25, 1 }
  0x14   : > { %p2774_p9 = por %p188_p6, %p52_p1  ;;  %p2337_p13 = scmp.lt.s32.totalorder %s2675_s23, 2 }
  0x15   : > { %s3190_s30 = scalar_select %p2770_p8, 1, 0 }
  0x16   : > { %s3191_s6 = scalar_select %p2774_p9, 1, 0 }
  0x17   : > { %s2779_s7 = scalar_select %p43_p7, %s2663_s20, %s45_s27  }
  0x18   : > { %p2781_p11 = por %p194_p10, %p58_p3  ;;  %s2788_s9 = sand.u32 1, %s2663_s20  }
  0x19   : > { %3192 = sst [smem:[#allocation14_spill]] %s2779_s7  ;;  %s238_s10 = sand.u32 1, %s2675_s23  }
  0x1a   : > { %s3193_s8 = scalar_select %p2781_p11, 1, 0 }
  0x1b   : > { %s1867_s11 = sshll.u32 %s2788_s9, 9  ;;  %p2794_p0 = pnand %p2337_p13, %p2762_p4 }
  0x1c   : > { %s2069_s13 = sshll.u32 %s2671_s22, 13  ;;  %s3195_s1 = sld [smem:[#allocation16_spill]] }
  0x1d   : > { %s242_s17 = scalar_lea.vmem [#allocation5], %s1867_s11  ;;  %s2806_s27 = scalar_lea.sflag [#allocation6], %s238_s10 }
  0x1e   : > { %s249_s25 = sshll.u32 %s242_s17, 4  ;;  %p2812_p2 = pneg %p2794_p0  ;;  %s2804_s25 = int_to_ptr.vmem [resolvable:$true] %s249_s25 }
  0x22   : > { %s2802_s16 = scalar_lea.hbm %s3195_s1, %s2069_s13  ;;  %s2504_s11 = scalar_lea.hbm %s3195_s1, 16384 }
  0x23   : > { %s2499_s28 = scalar_lea.hbm %s2802_s16, 8192  ;;  %p2505_p5 = scmp.lt.u32.totalorder %s2802_s16, %s3195_s1 }
  0x24   : > { %p2500_p1 = scmp.ne.s32.totalorder %s2802_s16, %s2499_s28  ;;  %p2506_p6 = scmp.lt.u32.totalorder %s2504_s11, %s2499_s28 }
  0x25   : > { %p2508_p10 = scmp.lt.u32.totalorder %s2499_s28, %s2802_s16 }
  0x26   : > { %p2502_p3 = pnand %p2812_p2, %p2500_p1  ;;  %p2507_p7 = por %p2506_p6, %p2505_p5 }
  0x28   : > { %p2503_p4 = pneg %p2502_p3  ;;  %p2509_p13 = por %p2508_p10, %p2507_p7 }
  0x2a   : > { %p2510_p12 = pnand %p2509_p13, %p2503_p4 }
  0x2c   : > { %2513 = shalt.err (!%p2510_p12)
}
  0x2d   : > { %s2514_s10 = scalar_lea.vmem %s2804_s25, 8192  ;;  %s2677_s13 = smov [#allocation5]  }
  0x2e   : > { %p2515_p1 = scmp.ne.s32.totalorder %s2804_s25, %s2514_s10  ;;  %s2519_s14 = sshll.u32 %s2677_s13, 4  ;;  %s2520_s14 = int_to_ptr.vmem [resolvable:$false] %s2519_s14 }
  0x2f   : > { %s2521_s15 = scalar_lea.vmem %s2520_s14, 16384  ;;  %p2522_p9 = scmp.lt.s32.totalorder %s2804_s25, %s2520_s14 }
  0x30   : > { %p2517_p3 = pnand %p2515_p1, %p2812_p2  ;;  %p2523_p8 = scmp.lt.s32.totalorder %s2521_s15, %s2514_s10 }
  0x32   : > { %p2518_p11 = pneg %p2517_p3  ;;  %p2524_p5 = por %p2523_p8, %p2522_p9 }
  0x34   : > { %p2525_p6 = pnand %p2524_p5, %p2518_p11 }
  0x36   : > { %2528 = shalt.err (!%p2525_p6)
}
  0x37   : > { %s3182_s28 = smov 64   ;;  %s3183_s11 = smov 4  }
  0x38   : > { %2329 = dma.hbm_to_vmem [thread:$0]  (!%p2794_p0), %s2802_s16, 8192, %s2804_s25, %s2806_s27, %s3182_s28, %s3182_s28, %s3183_s11  }
  0x39   : > { %p1871_p8 = scmp.ge.s32.totalorder %s2675_s23, 1  ;;  %p291_p9 = scmp.lt.s32.totalorder %s2675_s23, 3 }
  0x3a   : > { %s1864_s10 = sshll.u32 %s2788_s9, 6  ;;  %s2068_s13 = sshll.u32 %s2671_s22, 10 }
  0x3b   : > { %p2841_p11 = pnand %p1871_p8, %p291_p9  ;;  %s3198_s0 = sld [smem:[#allocation15_spill]] }
  0x3c   : > { %s218_s26 = scalar_lea.vmem [#allocation2], %s1864_s10  ;;  %s215_s16 = scalar_lea.sflag [#allocation3], %s2788_s9 }
  0x3d   : > { %s3197_s17 = scalar_select %p2841_p11, 1, 0 }
  0x3e   : > { %s228_s7 = sshll.u32 %s218_s26, 4  ;;  %s2852_s7 = int_to_ptr.vmem [resolvable:$true] %s228_s7 }
  0x41   : > { %s2850_s1 = scalar_lea.hbm %s3198_s0, %s2068_s13  ;;  %s2534_s14 = scalar_lea.hbm %s3198_s0, 2048 }
  0x42   : > { %s2529_s25 = scalar_lea.hbm %s2850_s1, 1024  ;;  %p2535_p10 = scmp.lt.u32.totalorder %s2850_s1, %s3198_s0 }
  0x43   : > { %p2530_p12 = scmp.ne.s32.totalorder %s2850_s1, %s2529_s25  ;;  %p2536_p13 = scmp.lt.u32.totalorder %s2534_s14, %s2529_s25 }
  0x44   : > { %p2538_p3 = scmp.lt.u32.totalorder %s2529_s25, %s2850_s1 }
  0x45   : > { %p2532_p4 = pnand %p2530_p12, %p2812_p2  ;;  %p2537_p1 = por %p2536_p13, %p2535_p10 }
  0x47   : > { %p2533_p7 = pneg %p2532_p4  ;;  %p2539_p5 = por %p2538_p3, %p2537_p1 }
  0x49   : > { %p2540_p6 = pnand %p2539_p5, %p2533_p7 }
  0x4b   : > { %2543 = shalt.err (!%p2540_p6)
}
  0x4c   : > { %s2544_s26 = scalar_lea.vmem %s2852_s7, 1024  ;;  %s2680_s28 = smov [#allocation2]  }
  0x4d   : > { %p2545_p8 = scmp.ne.s32.totalorder %s2852_s7, %s2544_s26  ;;  %s2549_s11 = sshll.u32 %s2680_s28, 4  ;;  %s2550_s11 = int_to_ptr.vmem [resolvable:$false] %s2549_s11 }
  0x4e   : > { %s2551_s10 = scalar_lea.vmem %s2550_s11, 2048  ;;  %p2552_p4 = scmp.lt.s32.totalorder %s2852_s7, %s2550_s11 }
  0x4f   : > { %p2547_p9 = pnand %p2545_p8, %p2812_p2  ;;  %p2553_p11 = scmp.lt.s32.totalorder %s2551_s10, %s2544_s26 }
  0x51   : > { %p2548_p12 = pneg %p2547_p9  ;;  %p2554_p10 = por %p2553_p11, %p2552_p4 }
  0x53   : > { %p2555_p13 = pnand %p2554_p10, %p2548_p12 }
  0x55   : > { %2558 = shalt.err (!%p2555_p13)
}
  0x56   : > { %s2681_s25 = smov 512   ;;  %s2682_s14 = smov 32  }
  0x57   : > { %2326 = dma.hbm_to_vmem [thread:$0]  (!%p2794_p0), %s2850_s1, 1024, %s2852_s7, %s215_s16, %s2681_s25, %s2681_s25, %s2682_s14  }
  0x58   : > { %s2311_s13 = smul.u32 320, %s2788_s9  ;;  %s2564_s9 = scalar_lea.hbm %s3176_s3, 10240 }
  0x59   : > { %s2312_s15 = smul.u32 5120, %s2671_s22 }
  0x5a   : > { %s269_s10 = scalar_lea.vmem [#allocation7], %s2311_s13 }
  0x5b   : > { %s2883_s26 = scalar_lea.hbm %s3176_s3, %s2312_s15  ;;  %s276_s0 = sshll.u32 %s269_s10, 4  ;;  %s2885_s0 = int_to_ptr.vmem [resolvable:$true] %s276_s0 }
  0x5c   : > { %s2559_s20 = scalar_lea.hbm %s2883_s26, 5120  ;;  %p2565_p3 = scmp.lt.u32.totalorder %s2883_s26, %s3176_s3 }
  0x5d   : > { %p2560_p11 = scmp.ne.s32.totalorder %s2883_s26, %s2559_s20  ;;  %p2566_p5 = scmp.lt.u32.totalorder %s2564_s9, %s2559_s20 }
  0x5e   : > { %p2568_p8 = scmp.lt.u32.totalorder %s2559_s20, %s2883_s26 }
  0x5f   : > { %p2562_p7 = pnand %p2560_p11, %p2812_p2  ;;  %p2567_p6 = por %p2566_p5, %p2565_p3 }
  0x61   : > { %p2563_p1 = pneg %p2562_p7  ;;  %p2569_p9 = por %p2568_p8, %p2567_p6 }
  0x63   : > { %p2570_p12 = pnand %p2569_p9, %p2563_p1 }
  0x65   : > { %2573 = shalt.err (!%p2570_p12)
}
  0x66   : > { %s2574_s14 = scalar_lea.vmem %s2885_s0, 5120  ;;  %s2683_s13 = smov [#allocation7]  }
  0x67   : > { %p2575_p4 = scmp.ne.s32.totalorder %s2885_s0, %s2574_s14  ;;  %s2579_s15 = sshll.u32 %s2683_s13, 4  ;;  %s2580_s15 = int_to_ptr.vmem [resolvable:$false] %s2579_s15 }
  0x68   : > { %s2581_s28 = scalar_lea.vmem %s2580_s15, 10240  ;;  %p2582_p11 = scmp.lt.s32.totalorder %s2885_s0, %s2580_s15 }
  0x69   : > { %p2577_p10 = pnand %p2575_p4, %p2812_p2  ;;  %p2583_p7 = scmp.lt.s32.totalorder %s2581_s28, %s2574_s14 }
  0x6b   : > { %p2578_p13 = pneg %p2577_p10  ;;  %p2584_p3 = por %p2583_p7, %p2582_p11 }
  0x6d   : > { %p2585_p5 = pnand %p2584_p3, %p2578_p13 }
  0x6f   : > { %2588 = shalt.err (!%p2585_p5)
}
  0x70   : > { %s3199_s20 = smov 4   ;;  %s3200_s11 = smov 64  }
  0x71   : > { %2332 = dma.hbm_to_vmem [thread:$0]  (!%p2794_p0), %s2883_s26, 5120, %s2885_s0, %s2806_s27, %s3200_s11, %s3200_s11, %s3199_s20  }
  0x72   : > { %p3201_p2 = scmp.ne.s32.totalorder %s3197_s17, 0 }
  0x73   : > { %s2915_s29 = sand.u32 (!%p3201_p2), 1, %s2659_s19   ;;  %p3202_p1 = scmp.ne.s32.totalorder (!%p3201_p2), %s3190_s30, 0 }
  0x74   : > { %295 = sbr.rel (%p3201_p2) target bundleno = 1527 (0x5f7), region = 40  ;;  %s1872_s10 = sshll.u32 (!%p3201_p2), %s2915_s29, 6 }
  0x75   : > { %s298_s1 = scalar_lea.sflag (!%p3201_p2), [#allocation3], %s2915_s29  ;;  %s2919_s7 = scalar_lea.vmem (!%p3201_p2), [#allocation2], %s1872_s10 }
  0x7b   : > { %2642 = dma.done.wait (%p3202_p1), %s298_s1, 1024  }
  0x7c   : > { %2644 = vsyncadd (%p3202_p1), %s298_s1, 4294966272  ;;  %s306_s0 = sand.u32 1, %s2750_s24   ;;  %s1873_s12 = sshll.u32 %s2915_s29, 9 }
  0x7d   : > { %s307_s27 = scalar_lea.sflag [#allocation6], %s306_s0  ;;  %s2927_s17 = scalar_lea.vmem [#allocation5], %s1873_s12 }
  0x7e   : > { %2646 = dma.done.wait (%p3202_p1), %s307_s27, 13312  }
  0x7f   : > { %2648 = vsyncadd (%p3202_p1), %s307_s27, 4294953984  ;;  %v2395_v0 = vld [vmem:[%s2927_s17 + $0x40] sm:$0xff]   ;;  %v2399_v4 = vld [vmem:[%s2927_s17 + $0x48] sm:$0xff]   ;;  %s2313_s24 = smul.u32 320, %s2915_s29  ;;  %vm2685_vm0 = vmmov 0   ;;  %p364_p0 = scmp.lt.s32.totalorder %s2667_s21, 1 }
  0x80   : > { %v2396_v1 = vld [vmem:[%s2927_s17 + $0xc0] sm:$0xff]   ;;  %2078 = vmatprep.subr.bf16.mxu0 %v2395_v0  ;;  %v2400_v5 = vld [vmem:[%s2927_s17 + $0xc8] sm:$0xff]   ;;  %v2403_v8 = vld [vmem:[%s2927_s17 + $0x50] sm:$0xff]   ;;  %s1874_s20 = sshll.u32 %s2915_s29, 3  ;;  %s2072_s1 = sshll.u32 %s2667_s21, 7 }
  0x81   : > { %v2397_v2 = vld [vmem:[%s2927_s17] sm:$0xff]   ;;  %2100 = vmatprep.subr.bf16.mxu1 %v2396_v1  ;;  %v2401_v6 = vld [vmem:[%s2927_s17 + $0x8] sm:$0xff]   ;;  %v2404_v9 = vld [vmem:[%s2927_s17 + $0xd0] sm:$0xff]   ;;  %s3008_s30 = scalar_lea.vmem [#allocation7], %s2313_s24  ;;  %s362_s11 = scalar_lea.vmem [#allocation8], %s1874_s20 }
  0x82   : > { %v2398_v3 = vld [vmem:[%s2927_s17 + $0x80] sm:$0xff]   ;;  %2079 = vmatpush3.bf16.msra.mxu0 %v2397_v2  ;;  %v2402_v7 = vld [vmem:[%s2927_s17 + $0x88] sm:$0xff]   ;;  %v2405_v10 = vld [vmem:[%s2927_s17 + $0x10] sm:$0xff]   ;;  %s3044_s26 = scalar_select %p364_p0, %s2667_s21, 1 }
  0x83   : > { %2101 = vmatpush3.bf16.msra.mxu1 %v2398_v3  ;;  %2080 = vmatprep.subr.bf16.mxu0 %v2399_v4  ;;  %v2406_v11 = vld [vmem:[%s2927_s17 + $0x90] sm:$0xff]   ;;  %v2407_v12 = vld [vmem:[%s2927_s17 + $0x58] sm:$0xff]   ;;  %v2411_v16 = vld [vmem:[%s2927_s17 + $0x60] sm:$0xff]   ;;  %s1709_s10 = sshll.u32 %s362_s11, 4  ;;  %s3124_s12 = scalar_lea.hbm %s3178_s5, %s2072_s1  ;;  %s3119_s10 = int_to_ptr.vmem [resolvable:$true] %s1709_s10 }
  0x84   : > { %2102 = vmatprep.subr.bf16.mxu1 %v2400_v5  ;;  %v2408_v13 = vld [vmem:[%s2927_s17 + $0xd8] sm:$0xff]   ;;  %v2412_v17 = vld [vmem:[%s2927_s17 + $0xe0] sm:$0xff]   ;;  %v2415_v20 = vld [vmem:[%s2927_s17 + $0x68] sm:$0xff]   ;;  %s366_s25 = scalar_lea.vmem %s3175_s2, %s3044_s26  ;;  %s2314_s14 = smul.u32 5, %s3044_s26 }
  0x85   : > { %v2409_v14 = vld [vmem:[%s2927_s17 + $0x18] sm:$0xff]   ;;  %v2413_v18 = vld [vmem:[%s2927_s17 + $0x20] sm:$0xff]   ;;  %v2416_v21 = vld [vmem:[%s2927_s17 + $0xe8] sm:$0xff]   ;;  %s1694_s27 = scalar_lea.sflag [#allocation4], %s2915_s29  ;;  %p3203_p8 = scmp.ne.s32.totalorder %s3191_s6, 0 }
  0x86   : > { %2081 = vmatpush3.bf16.msra.mxu0 %v2401_v6  ;;  %v2410_v15 = vld [vmem:[%s2927_s17 + $0x98] sm:$0xff]   ;;  %v2414_v19 = vld [vmem:[%s2927_s17 + $0xa0] sm:$0xff]   ;;  %v2417_v22 = vld [vmem:[%s2927_s17 + $0x28] sm:$0xff]   ;;  %s3072_s28 = scalar_lea.vmem %s3177_s4, %s2314_s14  ;;  %s2686_s21 = smov [#allocation8]  }
  0x87   : > { %2103 = vmatpush3.bf16.msra.mxu1 %v2402_v7  ;;  %2082 = vmatprep.subr.bf16.mxu0 %v2403_v8  ;;  %v2418_v23 = vld [vmem:[%s2927_s17 + $0xa8] sm:$0xff]   ;;  %v2419_v24 = vld [vmem:[%s2927_s17 + $0x70] sm:$0xff]   ;;  %v2423_v28 = vld [vmem:[%s2927_s17 + $0x78] sm:$0xff]   ;;  %s2593_s24 = sshll.u32 %s2686_s21, 4  ;;  %s2594_s24 = int_to_ptr.vmem [resolvable:$false] %s2593_s24 }
  0x88   : > { %2104 = vmatprep.subr.bf16.mxu1 %v2404_v9  ;;  %v2420_v25 = vld [vmem:[%s2927_s17 + $0xf0] sm:$0xff]   ;;  %v2424_v29 = vld [vmem:[%s2927_s17 + $0xf8] sm:$0xff]   ;;  %v373_v32 = vld [vmem:[%s2919_s7] sm:$0xff]  ;;  %p2596_p4 = scmp.lt.s32.totalorder %s3119_s10, %s2594_s24 }
  0x89   : > { %v2421_v26 = vld [vmem:[%s2927_s17 + $0x30] sm:$0xff]   ;;  %v2425_v30 = vld [vmem:[%s2927_s17 + $0x38] sm:$0xff]   ;;  %v377_v33 = vld [vmem:[%s2919_s7 + $0x20] sm:$0xff] }
  0x8a   : > { %2083 = vmatpush3.bf16.msra.mxu0 %v2405_v10  ;;  %v2422_v27 = vld [vmem:[%s2927_s17 + $0xb0] sm:$0xff]   ;;  %v2426_v31 = vld [vmem:[%s2927_s17 + $0xb8] sm:$0xff]   ;;  %v374_v34 = vld [vmem:[%s2919_s7 + $0x8] sm:$0xff]  ;;  %v1876_v35 = vcombine.low %v373_v32, %v377_v33  ;;  %v1877_v36 = vcombine.high %v373_v32, %v377_v33 }
  0x8b   : > { %2105 = vmatpush3.bf16.msra.mxu1 %v2406_v11  ;;  %2084 = vmatprep.subr.bf16.mxu0 %v2407_v12  ;;  %v378_v37 = vld [vmem:[%s2919_s7 + $0x28] sm:$0xff]  ;;  %v2427_v40 = vld [vmem:[%s2927_s17 + $0x140] sm:$0xff]   ;;  %v2435_v48 = vld [vmem:[%s2927_s17 + $0x150] sm:$0xff]  }
  0x8c   : > { %2106 = vmatprep.subr.bf16.mxu1 %v2408_v13  ;;  %v1878_v38 = vcombine.low %v374_v34, %v378_v37  ;;  %v1879_v39 = vcombine.high %v374_v34, %v378_v37  ;;  %972 = vmatprep.mubr.bf16.mxu0 %v1877_v36  ;;  %v2428_v41 = vld [vmem:[%s2927_s17 + $0x1c0] sm:$0xff]   ;;  %v2431_v44 = vld [vmem:[%s2927_s17 + $0x148] sm:$0xff]   ;;  %v2436_v49 = vld [vmem:[%s2927_s17 + $0x1d0] sm:$0xff]  }
  0x8d   : > { %v2429_v42 = vld [vmem:[%s2927_s17 + $0x100] sm:$0xff]   ;;  %v2432_v45 = vld [vmem:[%s2927_s17 + $0x1c8] sm:$0xff]   ;;  %v2437_v50 = vld [vmem:[%s2927_s17 + $0x110] sm:$0xff]  }
  0x8e   : > { %2085 = vmatpush3.bf16.msra.mxu0 %v2409_v14  ;;  %1013 = vmatprep.mubr.bf16.mxu1 %v1879_v39  ;;  %v2430_v43 = vld [vmem:[%s2927_s17 + $0x180] sm:$0xff]   ;;  %v2433_v46 = vld [vmem:[%s2927_s17 + $0x108] sm:$0xff]   ;;  %v2438_v51 = vld [vmem:[%s2927_s17 + $0x190] sm:$0xff]  }
  0x8f   : > { %2107 = vmatpush3.bf16.msra.mxu1 %v2410_v15  ;;  %2086 = vmatprep.subr.bf16.mxu0 %v2411_v16  ;;  %v2434_v47 = vld [vmem:[%s2927_s17 + $0x188] sm:$0xff]   ;;  %v2439_v52 = vld [vmem:[%s2927_s17 + $0x158] sm:$0xff]   ;;  %v2443_v56 = vld [vmem:[%s2927_s17 + $0x160] sm:$0xff]   ;;  %v2684_v16 = vmov 0.0  }
  0x90   : > { %2108 = vmatprep.subr.bf16.mxu1 %v2412_v17  ;;  %v2440_v53 = vld [vmem:[%s2927_s17 + $0x1d8] sm:$0xff]   ;;  %v2444_v57 = vld [vmem:[%s2927_s17 + $0x1e0] sm:$0xff]   ;;  %v2447_v60 = vld [vmem:[%s2927_s17 + $0x168] sm:$0xff]  }
  0x91   : > { %v2441_v54 = vld [vmem:[%s2927_s17 + $0x118] sm:$0xff]   ;;  %v2445_v58 = vld [vmem:[%s2927_s17 + $0x120] sm:$0xff]   ;;  %v2448_v61 = vld [vmem:[%s2927_s17 + $0x1e8] sm:$0xff]  }
  0x92   : > { %2087 = vmatpush3.bf16.msra.mxu0 %v2413_v18  ;;  %v2442_v55 = vld [vmem:[%s2927_s17 + $0x198] sm:$0xff]   ;;  %v2446_v59 = vld [vmem:[%s2927_s17 + $0x1a0] sm:$0xff]   ;;  %v2449_v62 = vld [vmem:[%s2927_s17 + $0x128] sm:$0xff]  }
  0x93   : > { %2109 = vmatpush3.bf16.msra.mxu1 %v2414_v19  ;;  %2088 = vmatprep.subr.bf16.mxu0 %v2415_v20  ;;  %v2450_v63 = vld [vmem:[%s2927_s17 + $0x1a8] sm:$0xff]   ;;  %v2451_v0 = vld [vmem:[%s2927_s17 + $0x170] sm:$0xff]   ;;  %v2455_v4 = vld [vmem:[%s2927_s17 + $0x178] sm:$0xff]  }
  0x94   : > { %2110 = vmatprep.subr.bf16.mxu1 %v2416_v21  ;;  %v2452_v1 = vld [vmem:[%s2927_s17 + $0x1f0] sm:$0xff]   ;;  %v2456_v5 = vld [vmem:[%s2927_s17 + $0x1f8] sm:$0xff]   ;;  %v2459_v17 = vld [vmem:[%s3008_s30] sm:$0xff]  }
  0x95   : > { %v2453_v2 = vld [vmem:[%s2927_s17 + $0x130] sm:$0xff]   ;;  %v2457_v6 = vld [vmem:[%s2927_s17 + $0x138] sm:$0xff]   ;;  %v2460_v18 = vld [vmem:[%s3008_s30 + $0x8] sm:$0xff]  }
  0x96   : > { %2089 = vmatpush3.bf16.msra.mxu0 %v2417_v22  ;;  %v2454_v3 = vld [vmem:[%s2927_s17 + $0x1b0] sm:$0xff]   ;;  %v2458_v7 = vld [vmem:[%s2927_s17 + $0x1b8] sm:$0xff]   ;;  %v2463_v21 = vld [vmem:[%s3008_s30 + $0x20] sm:$0xff]   ;;  %s2589_s17 = scalar_lea.vmem %s3119_s10, 128 }
  0x97   : > { %2111 = vmatpush3.bf16.msra.mxu1 %v2418_v23  ;;  %2090 = vmatprep.subr.bf16.mxu0 %v2419_v24  ;;  %v375_v8 = vld [vmem:[%s2919_s7 + $0x10] sm:$0xff]  ;;  %v376_v12 = vld [vmem:[%s2919_s7 + $0x18] sm:$0xff]  ;;  %v2464_v22 = vld [vmem:[%s3008_s30 + $0x28] sm:$0xff]   ;;  %p2590_p6 = scmp.ne.s32.totalorder %s3119_s10, %s2589_s17 }
  0x98   : > { %2112 = vmatprep.subr.bf16.mxu1 %v2420_v25  ;;  %v379_v9 = vld [vmem:[%s2919_s7 + $0x30] sm:$0xff]  ;;  %v380_v13 = vld [vmem:[%s2919_s7 + $0x38] sm:$0xff]  ;;  %v2467_v25 = vld [vmem:[%s3008_s30 + $0x40] sm:$0xff]  }
  0x99   : > { %v1880_v10 = vcombine.low %v375_v8, %v379_v9  ;;  %v1881_v11 = vcombine.high %v375_v8, %v379_v9  ;;  %v1882_v14 = vcombine.low %v376_v12, %v380_v13  ;;  %v1883_v15 = vcombine.high %v376_v12, %v380_v13  ;;  %v2461_v19 = vld [vmem:[%s3008_s30 + $0x10] sm:$0xff]   ;;  %v2462_v20 = vld [vmem:[%s3008_s30 + $0x18] sm:$0xff]   ;;  %v1875_v33 = vld [vmem:[%s366_s25] ss:$0 sm:$0xff]  ;;  %p2591_p9 = pnand %p2590_p6, %p3203_p8 }
  0x9a   : > { %2091 = vmatpush3.bf16.msra.mxu0 %v2421_v26  ;;  %v2465_v23 = vld [vmem:[%s3008_s30 + $0x30] sm:$0xff]   ;;  %v2466_v24 = vld [vmem:[%s3008_s30 + $0x38] sm:$0xff]   ;;  %v2468_v26 = vld [vmem:[%s3008_s30 + $0x48] sm:$0xff]  }
  0x9b   : > { %2113 = vmatpush3.bf16.msra.mxu1 %v2422_v27  ;;  %2092 = vmatprep.subr.bf16.mxu0 %v2423_v28  ;;  %v2469_v27 = vld [vmem:[%s3008_s30 + $0x50] sm:$0xff]   ;;  %v2470_v28 = vld [vmem:[%s3008_s30 + $0x58] sm:$0xff]   ;;  %v2479_v9 = vld [vmem:[%s3008_s30 + $0xa0] sm:$0xff]   ;;  %p2592_p12 = pneg %p2591_p9 }
  0x9c   : > { %2114 = vmatprep.subr.bf16.mxu1 %v2424_v29  ;;  %v2471_v29 = vld [vmem:[%s3008_s30 + $0x60] sm:$0xff]   ;;  %v2478_v8 = vld [vmem:[%s3008_s30 + $0x98] sm:$0xff]  }
  0x9e   : > { %2093 = vmatpush3.bf16.msra.mxu0 %v2425_v30  ;;  %v2472_v30 = vld [vmem:[%s3008_s30 + $0x68] sm:$0xff]  }
  0x9f   : > { %2115 = vmatpush3.bf16.msra.mxu1 %v2426_v31  ;;  %2122 = vmatprep.subr.bf16.mxu0 %v2427_v40 }
  0xa0   : > { %2144 = vmatprep.subr.bf16.mxu1 %v2428_v41 }
  0xa1   : > { %973 = vmatmul.mubr.bf16.vlgmr.msra.gmra.mrb[0].mxu0 %v1876_v35 }
  0xa2   : > { %1014 = vmatmul.mubr.bf16.vlgmr.msra.gmra.mrb[0].mxu1 %v1878_v38  ;;  %2123 = vmatpush3.bf16.msra.mxu0 %v2429_v42 }
  0xa3   : > { %2145 = vmatpush3.bf16.msra.mxu1 %v2430_v43  ;;  %2124 = vmatprep.subr.bf16.mxu0 %v2431_v44 }
  0xa4   : > { %2146 = vmatprep.subr.bf16.mxu1 %v2432_v45  ;;  %1054 = vmatprep.mubr.bf16.mxu0 %v1881_v11  ;;  %v1948_v11 = vld [vmem:[%s3072_s28] ss:$0 sm:$0xff] }
  0xa5   : > { %1095 = vmatprep.mubr.bf16.mxu1 %v1883_v15 }
  0xa6   : > { %2125 = vmatpush3.bf16.msra.mxu0 %v2433_v46 }
  0xa7   : > { %2147 = vmatpush3.bf16.msra.mxu1 %v2434_v47  ;;  %2126 = vmatprep.subr.bf16.mxu0 %v2435_v48 }
  0xa8   : > { %2148 = vmatprep.subr.bf16.mxu1 %v2436_v49 }
  0xaa   : > { %2127 = vmatpush3.bf16.msra.mxu0 %v2437_v50 }
  0xab   : > { %2149 = vmatpush3.bf16.msra.mxu1 %v2438_v51  ;;  %2128 = vmatprep.subr.bf16.mxu0 %v2439_v52 }
  0xac   : > { %2150 = vmatprep.subr.bf16.mxu1 %v2440_v53 }
  0xae   : > { %2129 = vmatpush3.bf16.msra.mxu0 %v2441_v54 }
  0xaf   : > { %2151 = vmatpush3.bf16.msra.mxu1 %v2442_v55  ;;  %2130 = vmatprep.subr.bf16.mxu0 %v2443_v56 }
  0xb0   : > { %2152 = vmatprep.subr.bf16.mxu1 %v2444_v57 }
  0xb2   : > { %2131 = vmatpush3.bf16.msra.mxu0 %v2445_v58 }
  0xb3   : > { %2153 = vmatpush3.bf16.msra.mxu1 %v2446_v59  ;;  %2132 = vmatprep.subr.bf16.mxu0 %v2447_v60 }
  0xb4   : > { %2154 = vmatprep.subr.bf16.mxu1 %v2448_v61 }
  0xb6   : > { %2133 = vmatpush3.bf16.msra.mxu0 %v2449_v62 }
  0xb7   : > { %2155 = vmatpush3.bf16.msra.mxu1 %v2450_v63  ;;  %2134 = vmatprep.subr.bf16.mxu0 %v2451_v0 }
  0xb8   : > { %2156 = vmatprep.subr.bf16.mxu1 %v2452_v1 }
  0xba   : > { %2135 = vmatpush3.bf16.msra.mxu0 %v2453_v2 }
  0xbb   : > { %2157 = vmatpush3.bf16.msra.mxu1 %v2454_v3  ;;  %2136 = vmatprep.subr.bf16.mxu0 %v2455_v4  ;;  %v2473_v3 = vld [vmem:[%s3008_s30 + $0x70] sm:$0xff]   ;;  %v2474_v4 = vld [vmem:[%s3008_s30 + $0x78] sm:$0xff]  }
  0xbc   : > { %2158 = vmatprep.subr.bf16.mxu1 %v2456_v5  ;;  %v2475_v5 = vld [vmem:[%s3008_s30 + $0x80] sm:$0xff]  }
  0xbe   : > { %2137 = vmatpush3.bf16.msra.mxu0 %v2457_v6  ;;  %v2476_v6 = vld [vmem:[%s3008_s30 + $0x88] sm:$0xff]  }
  0xbf   : > { %2159 = vmatpush3.bf16.msra.mxu1 %v2458_v7  ;;  %2211 = vmatprep.subr.bf16.mxu0 %v2684_v16  ;;  %v2477_v7 = vld [vmem:[%s3008_s30 + $0x90] sm:$0xff]  }
  0xc0   : > { %2231 = vmatprep.subr.bf16.mxu1 %v2684_v16 }
  0xc1   : > { %1055 = vmatmul.mubr.bf16.vlgmr.msra.gmra.mrb[4].mxu0 %v1880_v10  ;;  %v2480_v10 = vld [vmem:[%s3008_s30 + $0xa8] sm:$0xff]  }
  0xc2   : > { %1096 = vmatmul.mubr.bf16.vlgmr.msra.gmra.mrb[4].mxu1 %v1882_v14  ;;  %2212 = vmatpush3.bf16.msra.mxu0 %v2459_v17 }
  0xc3   : > { %2213 = vmatprep.subr.bf16.mxu0 %v2684_v16  ;;  %2227 = vmatprep.mubr.msk.bf16.mxu0 %vm2685_vm0, %v2684_v16 }
  0xc4   : > { %2247 = vmatprep.mubr.msk.bf16.mxu1 %vm2685_vm0, %v2684_v16  ;;  %2232 = vmatpush3.bf16.msra.mxu1 %v2467_v25  ;;  %v2484_v25 = vld [vmem:[%s3008_s30 + $0xc8] sm:$0xff]  }
  0xc5   : > { %2233 = vmatprep.subr.bf16.mxu1 %v2684_v16 }
  0xc6   : > { %2214 = vmatpush3.bf16.msra.mxu0 %v2460_v18 }
  0xc7   : > { %2215 = vmatprep.subr.bf16.mxu0 %v2684_v16 }
  0xc8   : > { %2234 = vmatpush3.bf16.msra.mxu1 %v2468_v26  ;;  %v2485_v26 = vld [vmem:[%s3008_s30 + $0xd0] sm:$0xff]  }
  0xc9   : > { %2235 = vmatprep.subr.bf16.mxu1 %v2684_v16 }
  0xca   : > { %2216 = vmatpush3.bf16.msra.mxu0 %v2461_v19 }
  0xcb   : > { %2217 = vmatprep.subr.bf16.mxu0 %v2684_v16 }
  0xcc   : > { %2236 = vmatpush3.bf16.msra.mxu1 %v2469_v27  ;;  %v2486_v27 = vld [vmem:[%s3008_s30 + $0xd8] sm:$0xff]  }
  0xcd   : > { %2237 = vmatprep.subr.bf16.mxu1 %v2684_v16 }
  0xce   : > { %2218 = vmatpush3.bf16.msra.mxu0 %v2462_v20 }
  0xcf   : > { %2219 = vmatprep.subr.bf16.mxu0 %v2684_v16 }
  0xd0   : > { %2238 = vmatpush3.bf16.msra.mxu1 %v2470_v28  ;;  %v2487_v28 = vld [vmem:[%s3008_s30 + $0xe0] sm:$0xff]  }
  0xd1   : > { %2239 = vmatprep.subr.bf16.mxu1 %v2684_v16 }
  0xd2   : > { %2220 = vmatpush3.bf16.msra.mxu0 %v2463_v21 }
  0xd3   : > { %2221 = vmatprep.subr.bf16.mxu0 %v2684_v16 }
  0xd4   : > { %2240 = vmatpush3.bf16.msra.mxu1 %v2471_v29  ;;  %v2488_v29 = vld [vmem:[%s3008_s30 + $0xe8] sm:$0xff]  }
  0xd5   : > { %2241 = vmatprep.subr.bf16.mxu1 %v2684_v16 }
  0xd6   : > { %2222 = vmatpush3.bf16.msra.mxu0 %v2464_v22  ;;  %v2481_v22 = vld [vmem:[%s3008_s30 + $0xb0] sm:$0xff]  }
  0xd7   : > { %2223 = vmatprep.subr.bf16.mxu0 %v2684_v16 }
  0xd8   : > { %2242 = vmatpush3.bf16.msra.mxu1 %v2472_v30  ;;  %v1974_v30 = vld [vmem:[%s3072_s28 + $0x1] ss:$0 sm:$0xff] }
  0xd9   : > { %2243 = vmatprep.subr.bf16.mxu1 %v2684_v16 }
  0xda   : > { %2224 = vmatpush3.bf16.msra.mxu0 %v2465_v23  ;;  %v2482_v23 = vld [vmem:[%s3008_s30 + $0xb8] sm:$0xff]  }
  0xdb   : > { %2225 = vmatprep.subr.bf16.mxu0 %v2684_v16 }
  0xdc   : > { %2244 = vmatpush3.bf16.msra.mxu1 %v2473_v3 }
  0xdd   : > { %2245 = vmatprep.subr.bf16.mxu1 %v2684_v16 }
  0xde   : > { %2226 = vmatpush3.bf16.msra.mxu0 %v2466_v24  ;;  %v2483_v24 = vld [vmem:[%s3008_s30 + $0xc0] sm:$0xff]  }
  0xdf   : > { %2251 = vmatprep.subr.bf16.mxu0 %v2684_v16 }
  0xe0   : > { %2246 = vmatpush3.bf16.msra.mxu1 %v2474_v4 }
  0xe1   : > { %2271 = vmatprep.subr.bf16.mxu1 %v2684_v16 }
 0x174   : > { %v2094_v31 = vpop.f32.mrb[0].mxu0 }
 0x175   : > { %v2116_v32 = vpop.f32.mrb[0].mxu1  ;;  %v2095_v34 = vpop.f32.mrb[1].mxu0 }
 0x176   : > { %v2096_v35 = vadd.f32 %v2095_v34, %v2094_v31  ;;  %v2117_v36 = vpop.f32.mrb[1].mxu1  ;;  %v2097_v37 = vpop.f32.mrb[2].mxu0 }
 0x177   : > { %v2118_v38 = vadd.f32 %v2117_v36, %v2116_v32  ;;  %v2119_v39 = vpop.f32.mrb[2].mxu1  ;;  %v2098_v40 = vpop.f32.mrb[3].mxu0 }
 0x178   : > { %v975_v41 = vadd.f32 %v2096_v35, %v1875_v33  ;;  %v2099_v42 = vadd.f32 %v2098_v40, %v2097_v37  ;;  %v2120_v43 = vpop.f32.mrb[3].mxu1  ;;  %v2491_v40 = vld [vmem:[%s3008_s30 + $0x100] sm:$0xff]  }
 0x179   : > { %v2121_v44 = vadd.f32 %v2120_v43, %v2119_v39  ;;  %v2490_v39 = vld [vmem:[%s3008_s30 + $0xf8] sm:$0xff]  }
 0x17a   : > { %v1016_v45 = vadd.f32 %v2118_v38, %v975_v41  ;;  %v978_v46 = vadd.f32 %v2099_v42, %v1875_v33  ;;  %v2489_v38 = vld [vmem:[%s3008_s30 + $0xf0] sm:$0xff]   ;;  %v2492_v41 = vld [vmem:[%s3008_s30 + $0x108] sm:$0xff]   ;;  %v2494_v43 = vld [vmem:[%s3008_s30 + $0x118] sm:$0xff]  }
 0x17b   : > { %v2493_v42 = vld [vmem:[%s3008_s30 + $0x110] sm:$0xff]  }
 0x17c   : > { %v1019_v47 = vadd.f32 %v2121_v44, %v978_v46  ;;  %v2495_v44 = vld [vmem:[%s3008_s30 + $0x120] sm:$0xff]  }
 0x17d   : > { %v2000_v46 = vld [vmem:[%s3072_s28 + $0x2] ss:$0 sm:$0xff] }
 0x194   : > { %v2138_v48 = vpop.f32.mrb[4].mxu0 }
 0x195   : > { %v2160_v49 = vpop.f32.mrb[4].mxu1  ;;  %v2139_v50 = vpop.f32.mrb[5].mxu0 }
 0x196   : > { %v2140_v51 = vadd.f32 %v2139_v50, %v2138_v48  ;;  %v2161_v52 = vpop.f32.mrb[5].mxu1  ;;  %v2141_v53 = vpop.f32.mrb[6].mxu0 }
 0x197   : > { %v2162_v54 = vadd.f32 %v2161_v52, %v2160_v49  ;;  %v2163_v55 = vpop.f32.mrb[6].mxu1  ;;  %v2142_v56 = vpop.f32.mrb[7].mxu0 }
 0x198   : > { %v1057_v57 = vadd.f32 %v2140_v51, %v1016_v45  ;;  %v2143_v58 = vadd.f32 %v2142_v56, %v2141_v53  ;;  %v2164_v59 = vpop.f32.mrb[7].mxu1  ;;  %v2496_v45 = vld [vmem:[%s3008_s30 + $0x128] sm:$0xff]   ;;  %v2497_v56 = vld [vmem:[%s3008_s30 + $0x130] sm:$0xff]  }
 0x199   : > { %v2165_v60 = vadd.f32 %v2164_v59, %v2163_v55 }
 0x19a   : > { %v1098_v61 = vadd.f32 %v2162_v54, %v1057_v57  ;;  %v1060_v62 = vadd.f32 %v2143_v58, %v1019_v47  ;;  %v2498_v57 = vld [vmem:[%s3008_s30 + $0x138] sm:$0xff]   ;;  %v2026_v58 = vld [vmem:[%s3072_s28 + $0x3] ss:$0 sm:$0xff]  ;;  %s2595_s30 = scalar_lea.vmem %s2594_s24, 256 }
 0x19b   : > { %p2597_p10 = scmp.lt.s32.totalorder %s2595_s30, %s2589_s17 }
 0x19c   : > { %v1101_v63 = vadd.f32 %v2165_v60, %v1060_v62  ;;  %v1104_v0 = vmax.f32 %v1098_v61, 0.0 }
 0x19d   : > { %p2598_p13 = por %p2597_p10, %p2596_p4 }
 0x19e   : > { %v1105_v1 = vmax.f32 %v1101_v63, 0.0 }
 0x19f   : > { %p2599_p11 = pnand %p2598_p13, %p2592_p12 }
 0x1a0   : > { %v1106_v2 = vpack.c.bf16 %v1105_v1, %v1104_v0 }
 0x1a2   : > { %2228 = vmatmul.mubr.bf16.vlgmr.msra.gmra.mrb[8].mxu0 %v1106_v2  ;;  %v2052_v2 = vld [vmem:[%s3072_s28 + $0x4] ss:$0 sm:$0xff] }
 0x1a3   : > { %2267 = vmatprep.mubr.msk.bf16.mxu0 %vm2685_vm0, %v2684_v16  ;;  %2252 = vmatpush3.bf16.msra.mxu0 %v2475_v5 }
 0x1a4   : > { %2253 = vmatprep.subr.bf16.mxu0 %v2684_v16 }
 0x1a7   : > { %2254 = vmatpush3.bf16.msra.mxu0 %v2476_v6 }
 0x1a8   : > { %2255 = vmatprep.subr.bf16.mxu0 %v2684_v16 }
 0x1ab   : > { %2256 = vmatpush3.bf16.msra.mxu0 %v2477_v7 }
 0x1ac   : > { %2257 = vmatprep.subr.bf16.mxu0 %v2684_v16 }
 0x1af   : > { %2258 = vmatpush3.bf16.msra.mxu0 %v2478_v8 }
 0x1b0   : > { %2259 = vmatprep.subr.bf16.mxu0 %v2684_v16 }
 0x1b3   : > { %2260 = vmatpush3.bf16.msra.mxu0 %v2479_v9 }
 0x1b4   : > { %2261 = vmatprep.subr.bf16.mxu0 %v2684_v16 }
 0x1b7   : > { %2262 = vmatpush3.bf16.msra.mxu0 %v2480_v10 }
 0x1b8   : > { %2263 = vmatprep.subr.bf16.mxu0 %v2684_v16 }
 0x1bb   : > { %2264 = vmatpush3.bf16.msra.mxu0 %v2481_v22 }
 0x1bc   : > { %2265 = vmatprep.subr.bf16.mxu0 %v2684_v16 }
 0x1bf   : > { %2266 = vmatpush3.bf16.msra.mxu0 %v2482_v23 }
 0x1c0   : > { %2291 = vmatprep.subr.bf16.mxu0 %v2684_v16 }
 0x275   : > { %v1212_v12 = vpop.f32.mrb[8].mxu0 }
 0x276   : > { %v1213_v13 = vadd.f32 %v1948_v11, %v1212_v12  ;;  %v2229_v14 = vpop.f32.mrb[9].mxu0 }
 0x277   : > { %v1215_v15 = vpop.f32.mrb[10].mxu0 }
 0x278   : > { %v1216_v17 = vadd.f32 %v1948_v11, %v1215_v15  ;;  %v2230_v18 = vpop.f32.mrb[11].mxu0  ;;  %v1219_v19 = vmax.f32 %v1213_v13, 0.0 }
 0x27a   : > { %v1220_v20 = vmax.f32 %v1216_v17, 0.0 }
 0x27c   : > { %v1221_v21 = vpack.c.bf16 %v1220_v20, %v1219_v19 }
 0x27e   : > { %2248 = vmatmul.mubr.bf16.vlgmr.msra.gmra.mrb[8].mxu1 %v1221_v21 }
 0x27f   : > { %2287 = vmatprep.mubr.msk.bf16.mxu1 %vm2685_vm0, %v2684_v16  ;;  %2272 = vmatpush3.bf16.msra.mxu1 %v2483_v24 }
 0x280   : > { %2273 = vmatprep.subr.bf16.mxu1 %v2684_v16 }
 0x283   : > { %2274 = vmatpush3.bf16.msra.mxu1 %v2484_v25 }
 0x284   : > { %2275 = vmatprep.subr.bf16.mxu1 %v2684_v16 }
 0x287   : > { %2276 = vmatpush3.bf16.msra.mxu1 %v2485_v26 }
 0x288   : > { %2277 = vmatprep.subr.bf16.mxu1 %v2684_v16 }
 0x28b   : > { %2278 = vmatpush3.bf16.msra.mxu1 %v2486_v27 }
 0x28c   : > { %2279 = vmatprep.subr.bf16.mxu1 %v2684_v16 }
 0x28f   : > { %2280 = vmatpush3.bf16.msra.mxu1 %v2487_v28 }
 0x290   : > { %2281 = vmatprep.subr.bf16.mxu1 %v2684_v16 }
 0x293   : > { %2282 = vmatpush3.bf16.msra.mxu1 %v2488_v29 }
 0x294   : > { %2283 = vmatprep.subr.bf16.mxu1 %v2684_v16 }
 0x297   : > { %2284 = vmatpush3.bf16.msra.mxu1 %v2489_v38 }
 0x298   : > { %2285 = vmatprep.subr.bf16.mxu1 %v2684_v16 }
 0x29b   : > { %2286 = vmatpush3.bf16.msra.mxu1 %v2490_v39 }
 0x351   : > { %v1329_v31 = vpop.f32.mrb[8].mxu1 }
 0x352   : > { %v2249_v32 = vpop.f32.mrb[9].mxu1  ;;  %v1330_v34 = vadd.f32 %v1974_v30, %v1329_v31 }
 0x353   : > { %v1332_v33 = vpop.f32.mrb[10].mxu1 }
 0x354   : > { %v1333_v35 = vadd.f32 %v1974_v30, %v1332_v33  ;;  %v2250_v36 = vpop.f32.mrb[11].mxu1 }
 0x356   : > { %v1336_v37 = vpack.c.bf16 %v1333_v35, %v1330_v34 }
 0x358   : > { %2268 = vmatmul.mubr.bf16.vlgmr.msra.gmra.mrb[12].mxu0 %v1336_v37 }
 0x359   : > { %2307 = vmatprep.mubr.msk.bf16.mxu0 %vm2685_vm0, %v2684_v16  ;;  %2292 = vmatpush3.bf16.msra.mxu0 %v2491_v40 }
 0x35a   : > { %2293 = vmatprep.subr.bf16.mxu0 %v2684_v16 }
 0x35d   : > { %2294 = vmatpush3.bf16.msra.mxu0 %v2492_v41 }
 0x35e   : > { %2295 = vmatprep.subr.bf16.mxu0 %v2684_v16 }
 0x361   : > { %2296 = vmatpush3.bf16.msra.mxu0 %v2493_v42 }
 0x362   : > { %2297 = vmatprep.subr.bf16.mxu0 %v2684_v16 }
 0x365   : > { %2298 = vmatpush3.bf16.msra.mxu0 %v2494_v43 }
 0x366   : > { %2299 = vmatprep.subr.bf16.mxu0 %v2684_v16 }
 0x369   : > { %2300 = vmatpush3.bf16.msra.mxu0 %v2495_v44 }
 0x36a   : > { %2301 = vmatprep.subr.bf16.mxu0 %v2684_v16 }
 0x36d   : > { %2302 = vmatpush3.bf16.msra.mxu0 %v2496_v45 }
 0x36e   : > { %2303 = vmatprep.subr.bf16.mxu0 %v2684_v16 }
 0x371   : > { %2304 = vmatpush3.bf16.msra.mxu0 %v2497_v56 }
 0x372   : > { %2305 = vmatprep.subr.bf16.mxu0 %v2684_v16 }
 0x375   : > { %2306 = vmatpush3.bf16.msra.mxu0 %v2498_v57 }
 0x42b   : > { %v1444_v47 = vpop.f32.mrb[12].mxu0 }
 0x42c   : > { %v1445_v48 = vadd.f32 %v2000_v46, %v1444_v47  ;;  %v2269_v49 = vpop.f32.mrb[13].mxu0 }
 0x42d   : > { %v1447_v50 = vpop.f32.mrb[14].mxu0 }
 0x42e   : > { %v1448_v51 = vadd.f32 %v2000_v46, %v1447_v50  ;;  %v2270_v52 = vpop.f32.mrb[15].mxu0  ;;  %v1451_v53 = vmax.f32 %v1445_v48, 0.0 }
 0x430   : > { %v1452_v54 = vmax.f32 %v1448_v51, 0.0 }
 0x432   : > { %v1453_v55 = vpack.c.bf16 %v1452_v54, %v1451_v53 }
 0x434   : > { %2288 = vmatmul.mubr.bf16.vlgmr.msra.gmra.mrb[12].mxu1 %v1453_v55 }
 0x507   : > { %v1561_v59 = vpop.f32.mrb[12].mxu1 }
 0x508   : > { %v2289_v60 = vpop.f32.mrb[13].mxu1  ;;  %v1562_v62 = vadd.f32 %v2026_v58, %v1561_v59 }
 0x509   : > { %v1564_v61 = vpop.f32.mrb[14].mxu1 }
 0x50a   : > { %v1565_v63 = vadd.f32 %v2026_v58, %v1564_v61  ;;  %v2290_v0 = vpop.f32.mrb[15].mxu1 }
 0x50c   : > { %v1568_v1 = vpack.c.bf16 %v1565_v63, %v1562_v62 }
 0x50e   : > { %2308 = vmatmul.mubr.bf16.vlgmr.msra.gmra.mrb[16].mxu0 %v1568_v1 }
 0x5e1   : > { %v1676_v3 = vpop.f32.mrb[16].mxu0 }
 0x5e2   : > { %v2309_v4 = vpop.f32.mrb[17].mxu0  ;;  %v1677_v5 = vadd.f32 %v2052_v2, %v1676_v3 }
 0x5e3   : > { %v1679_v16 = vpop.f32.mrb[18].mxu0 }
 0x5e4   : > { %v1680_v6 = vadd.f32 %v2052_v2, %v1679_v16  ;;  %v2310_v7 = vpop.f32.mrb[19].mxu0 }
 0x5e6   : > { %v2076_v8 = vpack.c.bf16 %v1680_v6, %v1677_v5 }
 0x5e8   : > { %2077 = vst [vmem:[%s362_s11] sm:$0xff] %v2076_v8  }
 0x5e9   : > { %2602 = shalt.err (!%p2599_p11)
}
 0x5ea   : > { %s2603_s26 = scalar_lea.hbm %s3124_s12, 128  ;;  %s2607_s25 = scalar_lea.hbm %s3178_s5, 256 }
 0x5eb   : > { %p2604_p7 = scmp.ne.s32.totalorder %s3124_s12, %s2603_s26  ;;  %p2608_p2 = scmp.lt.u32.totalorder %s3124_s12, %s3178_s5 }
 0x5ec   : > { %p2609_p1 = scmp.lt.u32.totalorder %s2607_s25, %s2603_s26  ;;  %p2611_p6 = scmp.lt.u32.totalorder %s2603_s26, %s3124_s12 }
 0x5ed   : > { %p2605_p3 = pnand %p2604_p7, %p3203_p8 }
 0x5ee   : > { %p2610_p0 = por %p2609_p1, %p2608_p2 }
 0x5ef   : > { %p2606_p5 = pneg %p2605_p3 }
 0x5f0   : > { %p2612_p9 = por %p2611_p6, %p2610_p0 }
 0x5f2   : > { %p2613_p12 = pnand %p2612_p9, %p2606_p5 }
 0x5f4   : > { %2616 = shalt.err (!%p2613_p12)
}
 0x5f5   : > { %s2687_s15 = smov 64   ;;  %s2688_s28 = smov 4  }
 0x5f6   : > { %2321 = dma.vmem_to_hbm [thread:$0]  (%p3203_p8), %s3119_s10, 128, %s3124_s12, %s1694_s27, %s2687_s15, %s2687_s15, %s2688_s28  }
 0x5f7 PF: > { %s1724_s20 = sand.u32 1, %s2655_s18   ;;  %p3204_p4 = scmp.ne.s32.totalorder %s3193_s8, 0 }
 0x5f8   : > { %p3205_p10 = scmp.ge.s32.totalorder %s2675_s23, 2  ;;  %s1725_s11 = scalar_lea.sflag [#allocation4], %s1724_s20 }
 0x5fa   : > { %p2334_p13 = pnand %p3205_p10, %p3204_p4 }
 0x5fc   : > { %2650 = dma.done.wait (!%p2334_p13), %s1725_s11, 128  }
 0x5fd   : > { %2652 = vsyncadd (!%p2334_p13), %s1725_s11, 4294967168  ;;  %s24_s23 = sadd.s32 1, %s2675_s23   ;;  %s3206_s1 = sld [smem:[#allocation12_spill]] }
 0x5fe   : > { %p21_p11 = scmp.ge.s32.totalorder %s24_s23, 4   ;;  %s3207_s20 = sld [smem:[#allocation14_spill]] }
 0x5ff   : > { %s3208_s6 = sld [smem:[#allocation13_spill]]  ;;  %s3209_s18 = smov %s2659_s19 }
 0x600   : > { %s3211_s21 = smov %s2671_s22  ;;  %23 = sbr.rel (!%p21_p11) target bundleno = 11 (0xb), region = 123 }
 0x603   : > { %s3210_s19 = smov %s3206_s1 }
 0x605   : > { %s3212_s22 = smov %s3208_s6 }
 0x607   :  { %1730 = vsyncpa [#allocation3], 1 }
 0x608   :  { %1732 = vsyncpa [#allocation3 + $0x1], 1 }
 0x609   :  { %1733 = vsyncpa [#allocation6], 1 }
 0x60a   :  { %1735 = vsyncpa [#allocation6 + $0x1], 1 }
 0x60b   :  { %1736 = vsyncpa [#allocation4], 1 }
 0x60c   :  { %1738 = vsyncpa [#allocation4 + $0x1], 1 }

</bundles_post_ra>
